<compile_context>
chip_gen: v7x
topology: tpu7x:2x2x1
jax: 0.10.0
libtpu: 0.0.40
codegen_flags: <defaults>
</compile_context>

<pallas_src>
import jax
import jax.numpy as jnp
from jax.experimental import pallas as pl
from jax.experimental.pallas import tpu as pltpu


def _make_kernel(heads, apply_project, compute_dtype):
    """Build the kernel body.  `apply_project` statically removes the optional
    1x1 projection (no identity matmul when the module's project is None)."""

    def kernel(gamma_ref, fmap_ref, attn_ref, wvT_ref, *rest):
        if apply_project:
            wpT_ref, out_ref = rest
        else:
            (out_ref,) = rest

        tq = out_ref.shape[1]
        inner_dim = wvT_ref.shape[1]
        dim_head = inner_dim // heads
        qi = pl.program_id(1)

        fm_full = fmap_ref[0]                                # (N, dim)

        # V for all heads in one lane-dense matmul (output width = inner_dim).
        # Recomputed per query tile: kernel is HBM-bound on the attention
        # stream, so MXU slack covers it and both grid axes stay parallel.
        v_all = jnp.dot(fm_full, wvT_ref[...],
                        preferred_element_type=jnp.float32)  # (N, inner_dim)
        v_c = v_all.astype(compute_dtype)                    # bf16 for MXU rate

        # Per-head attention readout (static, unrolled).  attn tiles are cast
        # to bf16 here (not in the wrapper) to avoid an extra HBM pass.
        o_parts = []
        for h in range(heads):
            a_h = attn_ref[0, h].astype(compute_dtype)       # (tq, N)
            v_h = v_c[:, h * dim_head:(h + 1) * dim_head]    # (N, dim_head)
            o_parts.append(jnp.dot(a_h, v_h,
                                   preferred_element_type=jnp.float32))
        o_all = jnp.concatenate(o_parts, axis=-1) if heads > 1 else o_parts[0]

        if apply_project:
            # Single projection with lane-dense contraction (= inner_dim).
            proj = jnp.dot(o_all, wpT_ref[...],
                           preferred_element_type=jnp.float32)  # (tq, dim)
        else:
            proj = o_all                                     # project == identity

        q0 = pl.multiple_of(qi * tq, tq)
        fm_tile = fmap_ref[0, pl.ds(q0, tq), :].astype(jnp.float32)
        out_ref[0] = (fm_tile + gamma_ref[0] * proj).astype(out_ref.dtype)

    return kernel


def _pick_q_tile(n_q, n_kv, heads, dim, inner_dim, attn_bytes, vmem_budget,
                 target, apply_project):
    """Largest multiple-of-16 divisor of n_q that fits the VMEM budget."""
    # Fixed per-step VMEM (f32): fmap block (x2 bufs), weights (x2 each),
    # V intermediate (+ its bf16 cast, counted as f32 for slack).
    w_bytes = 2 * dim * inner_dim * 4 * (2 if apply_project else 1)
    fixed = 2 * n_kv * dim * 4 + w_bytes + 2 * n_kv * inner_dim * 4
    avail = max(vmem_budget - fixed, 0)
    # Per query row: double-buffered attn + out block + intermediates.
    per_q = (2 * heads * n_kv * attn_bytes
             + 2 * dim * 4
             + 2 * inner_dim * 4)
    cap = min(max(avail // per_q, 16), target)
    if n_q <= cap:
        return n_q
    tq = (int(cap) // 16) * 16
    while tq >= 16:
        if n_q % tq == 0:
            return tq
        tq -= 16
    return n_q  # no nice divisor; fall back to full extent


def aggregate_forward(attn, fmap, wv, wp, gamma, *, heads,
                      compute_dtype=jnp.bfloat16, q_tile_target=1024):
    """attn: (B, heads, N, N), fmap: (B, dim, H, W)  [NCHW, like PyTorch].

    wv: (inner_dim, dim)            -- 1x1 conv weight of to_v (squeezed)
    wp: (dim, inner_dim) or None    -- 1x1 conv weight of project
    gamma: scalar
    """
    B, dim, H, W = fmap.shape
    N = H * W
    inner_dim = wv.shape[0]
    assert inner_dim % heads == 0
    dim_head = inner_dim // heads
    assert attn.shape == (B, heads, N, N)
    apply_project = wp is not None
    if not apply_project:
        assert inner_dim == dim, "project=None requires dim == heads*dim_head"

    # --- layout plumbing (plain JAX; weights pre-transposed for the kernel) ---
    # TODO(synk): if profiling shows these NCHW<->NHWC transposes as standalone
    # HBM round trips, fold them into the kernel's BlockSpecs instead.
    fmap_flat = jnp.transpose(fmap, (0, 2, 3, 1)).reshape(B, N, dim)
    wvT = jnp.transpose(wv)                                  # (dim, inner_dim)
    gamma_arr = jnp.asarray(gamma, dtype=jnp.float32).reshape(1)

    attn_bytes = attn.dtype.itemsize                         # stream native dtype

    # --- generation-aware tiling / VMEM budget ---
    try:
        vmem_cap = int(pltpu.get_tpu_info().vmem_capacity_bytes)
    except Exception:
        vmem_cap = 64 << 20                                  # v7x-safe fallback
    vmem_limit = min(vmem_cap * 3 // 4, 96 << 20)
    tq = _pick_q_tile(N, N, heads, dim, inner_dim, attn_bytes,
                      int(vmem_limit * 0.8), q_tile_target, apply_project)
    num_q = N // tq
    grid = (B, num_q)

    flops = (2 * B * num_q * N * dim * inner_dim             # V (per q-tile)
             + 2 * B * heads * N * N * dim_head)             # attn @ V
    if apply_project:
        flops += 2 * B * N * inner_dim * dim                 # projection
    bytes_accessed = (B * heads * N * N * attn_bytes         # attention stream
                      + 2 * B * N * dim * fmap.dtype.itemsize
                      + 2 * dim * inner_dim * wv.dtype.itemsize)
    cost = pl.CostEstimate(flops=int(flops), transcendentals=0,
                           bytes_accessed=int(bytes_accessed))

    in_specs = [
        pl.BlockSpec(memory_space=pltpu.MemorySpace.SMEM),            # gamma
        pl.BlockSpec((1, N, dim), lambda b, q: (b, 0, 0)),            # fmap
        pl.BlockSpec((1, heads, tq, N), lambda b, q: (b, 0, q, 0)),   # attn
        pl.BlockSpec((dim, inner_dim), lambda b, q: (0, 0)),          # WvT
    ]
    args = [gamma_arr, fmap_flat, attn, wvT]
    if apply_project:
        wpT = jnp.transpose(wp)                              # (inner_dim, dim)
        in_specs.append(pl.BlockSpec((inner_dim, dim), lambda b, q: (0, 0)))
        args.append(wpT)

    kernel = _make_kernel(heads, apply_project, compute_dtype)

    out_flat = pl.pallas_call(
        kernel,
        out_shape=jax.ShapeDtypeStruct((B, N, dim), fmap.dtype),
        grid=grid,
        in_specs=in_specs,
        out_specs=pl.BlockSpec((1, tq, dim), lambda b, q: (b, q, 0)),
        compiler_params=pltpu.CompilerParams(
            dimension_semantics=("parallel", "parallel"),
            vmem_limit_bytes=int(vmem_limit)),
        cost_estimate=cost,
    )(*args)

    # back to NCHW
    return jnp.transpose(out_flat.reshape(B, H, W, dim), (0, 3, 1, 2))


def _reference(attn, fmap, wv, wp, gamma, *, heads):
    """Pure-JAX reference mirroring the PyTorch forward exactly (f32)."""
    B, dim, H, W = fmap.shape
    N = H * W
    inner_dim = wv.shape[0]
    dim_head = inner_dim // heads
    fmap_flat = jnp.transpose(fmap, (0, 2, 3, 1)).reshape(B, N, dim)
    v = jnp.einsum('bnc,ec->bne', fmap_flat, wv)                     # (B, N, inner)
    v = v.reshape(B, N, heads, dim_head).transpose(0, 2, 1, 3)       # (B, h, N, d)
    out = jnp.einsum('bhij,bhjd->bhid', attn, v)                     # (B, h, N, d)
    out = out.transpose(0, 2, 1, 3).reshape(B, N, inner_dim)         # '(h d)' order
    if wp is not None:
        out = jnp.einsum('bne,ce->bnc', out, wp)
    out = fmap_flat + gamma * out
    return jnp.transpose(out.reshape(B, H, W, dim), (0, 3, 1, 2))


if __name__ == "__main__":
    # Config 1: dim=16, heads=2, dim_head=16 -> inner_dim=32 != dim,
    # so the `project` 1x1 conv is active.
    B, dim, H, W = 2, 16, 8, 8
    heads, dim_head = 2, 16
    inner_dim = heads * dim_head
    N = H * W

    key = jax.random.PRNGKey(0)
    k1, k2, k3, k4 = jax.random.split(key, 4)
    fmap = jax.random.normal(k1, (B, dim, H, W), dtype=jnp.float32)
    attn = jax.nn.softmax(
        jax.random.normal(k2, (B, heads, N, N), dtype=jnp.float32), axis=-1)
    wv = 0.05 * jax.random.normal(k3, (inner_dim, dim), dtype=jnp.float32)
    wp = 0.05 * jax.random.normal(k4, (dim, inner_dim), dtype=jnp.float32)
    gamma = jnp.float32(0.5)

    out = jax.block_until_ready(
        aggregate_forward(attn, fmap, wv, wp, gamma, heads=heads))
    ref = _reference(attn, fmap, wv, wp, gamma, heads=heads)
    assert out.shape == (B, dim, H, W)
    # attn/V use bf16 on the MXU inside the kernel -> loosened tolerance.
    assert jnp.allclose(out, ref, rtol=1e-2, atol=1e-2), "mismatch (projected)"

    # Config 2: dim == inner_dim -> module sets project=None (identity path,
    # compiled out of the kernel: no identity matmul).
    dim2, heads2 = 32, 2
    inner2 = heads2 * 16
    k5, k6, k7 = jax.random.split(jax.random.PRNGKey(1), 3)
    fmap2 = jax.random.normal(k5, (1, dim2, H, W), dtype=jnp.float32)
    attn2 = jax.nn.softmax(
        jax.random.normal(k6, (1, heads2, N, N), dtype=jnp.float32), axis=-1)
    wv2 = 0.05 * jax.random.normal(k7, (inner2, dim2), dtype=jnp.float32)
    out2 = jax.block_until_ready(
        aggregate_forward(attn2, fmap2, wv2, None, gamma, heads=heads2))
    ref2 = _reference(attn2, fmap2, wv2, None, gamma, heads=heads2)
    assert jnp.allclose(out2, ref2, rtol=1e-2, atol=1e-2), "mismatch (identity)"

    print("KERNEL_OK")
</pallas_src>

<mosaic_0001>
module attributes {stable_mosaic.version = 11 : i64} {
  func.func @kernel(%arg0: i32, %arg1: i32, %arg2: memref<1xf32, #tpu.memory_space<smem>>, %arg3: memref<1x64x16xf32, #tpu.memory_space<vmem>>, %arg4: memref<1x2x64x64xf32, #tpu.memory_space<vmem>>, %arg5: memref<16x32xf32, #tpu.memory_space<vmem>>, %arg6: memref<32x16xf32, #tpu.memory_space<vmem>>, %arg7: memref<1x64x16xf32, #tpu.memory_space<vmem>>) attributes {dimension_semantics = [#tpu.dimension_semantics<parallel>, #tpu.dimension_semantics<parallel>], iteration_bounds = array<i64: 2, 1>, scalar_prefetch = 0 : i64, scratch_operands = 0 : i64, tpu.core_type = #tpu.core_type<tc>, window_params = [{transform_indices = @transform_0, window_bounds = array<i64: 1>}, {transform_indices = @transform_1, window_bounds = array<i64: 1, 64, 16>}, {transform_indices = @transform_2, window_bounds = array<i64: 1, 2, 64, 64>}, {pipeline_mode = #tpu.pipeline_mode<synchronous>, transform_indices = @transform_3, window_bounds = array<i64: 16, 32>}, {pipeline_mode = #tpu.pipeline_mode<synchronous>, transform_indices = @transform_4, window_bounds = array<i64: 32, 16>}, {transform_indices = @transform_5, window_bounds = array<i64: 1, 64, 16>}]} {
    %c0 = arith.constant 0 : index
    %c0_0 = arith.constant 0 : index
    %c0_1 = arith.constant 0 : index
    %0 = vector.load %arg3[%c0, %c0_0, %c0_1] : memref<1x64x16xf32, #tpu.memory_space<vmem>>, vector<1x64x16xf32>
    %1 = vector.shape_cast %0 : vector<1x64x16xf32> to vector<64x16xf32>
    %c0_2 = arith.constant 0 : index
    %c0_3 = arith.constant 0 : index
    %2 = vector.load %arg5[%c0_2, %c0_3] : memref<16x32xf32, #tpu.memory_space<vmem>>, vector<16x32xf32>
    %cst = arith.constant dense<0.000000e+00> : vector<64x32xf32>
    %3 = tpu.matmul %1, %2, %cst {dimension_numbers = #tpu.dot_dimension_numbers<[1], [0], [0], [1], [0, 0, 1, 1], [], []>} : vector<64x16xf32>, vector<16x32xf32>, vector<64x32xf32> -> vector<64x32xf32>
    %4 = arith.truncf %3 : vector<64x32xf32> to vector<64x32xbf16>
    %c0_4 = arith.constant 0 : index
    %c0_5 = arith.constant 0 : index
    %c0_6 = arith.constant 0 : index
    %c0_7 = arith.constant 0 : index
    %5 = vector.load %arg4[%c0_4, %c0_5, %c0_6, %c0_7] : memref<1x2x64x64xf32, #tpu.memory_space<vmem>>, vector<1x1x64x64xf32>
    %6 = vector.shape_cast %5 : vector<1x1x64x64xf32> to vector<64x64xf32>
    %7 = arith.truncf %6 : vector<64x64xf32> to vector<64x64xbf16>
    %8 = vector.extract_strided_slice %4 {offsets = [0, 0], sizes = [64, 16], strides = [1, 1]} : vector<64x32xbf16> to vector<64x16xbf16>
    %cst_8 = arith.constant dense<0.000000e+00> : vector<64x16xf32>
    %9 = tpu.matmul %7, %8, %cst_8 {dimension_numbers = #tpu.dot_dimension_numbers<[1], [0], [0], [1], [0, 0, 1, 1], [], []>} : vector<64x64xbf16>, vector<64x16xbf16>, vector<64x16xf32> -> vector<64x16xf32>
    %c0_9 = arith.constant 0 : index
    %c1 = arith.constant 1 : index
    %c0_10 = arith.constant 0 : index
    %c0_11 = arith.constant 0 : index
    %10 = vector.load %arg4[%c0_9, %c1, %c0_10, %c0_11] : memref<1x2x64x64xf32, #tpu.memory_space<vmem>>, vector<1x1x64x64xf32>
    %11 = vector.shape_cast %10 : vector<1x1x64x64xf32> to vector<64x64xf32>
    %12 = arith.truncf %11 : vector<64x64xf32> to vector<64x64xbf16>
    %13 = vector.extract_strided_slice %4 {offsets = [0, 16], sizes = [64, 16], strides = [1, 1]} : vector<64x32xbf16> to vector<64x16xbf16>
    %cst_12 = arith.constant dense<0.000000e+00> : vector<64x16xf32>
    %14 = tpu.matmul %12, %13, %cst_12 {dimension_numbers = #tpu.dot_dimension_numbers<[1], [0], [0], [1], [0, 0, 1, 1], [], []>} : vector<64x64xbf16>, vector<64x16xbf16>, vector<64x16xf32> -> vector<64x16xf32>
    %15 = tpu.concatenate %9, %14 in 1 : vector<64x16xf32>, vector<64x16xf32> -> vector<64x32xf32>
    %c0_13 = arith.constant 0 : index
    %c0_14 = arith.constant 0 : index
    %16 = vector.load %arg6[%c0_13, %c0_14] : memref<32x16xf32, #tpu.memory_space<vmem>>, vector<32x16xf32>
    %cst_15 = arith.constant dense<0.000000e+00> : vector<64x16xf32>
    %17 = tpu.matmul %15, %16, %cst_15 {dimension_numbers = #tpu.dot_dimension_numbers<[1], [0], [0], [1], [0, 0, 1, 1], [], []>} : vector<64x32xf32>, vector<32x16xf32>, vector<64x16xf32> -> vector<64x16xf32>
    %c64_i32 = arith.constant 64 : i32
    %18 = arith.muli %arg1, %c64_i32 : i32
    %19 = tpu.assume_multiple %18, 64 : i32
    %c0_16 = arith.constant 0 : index
    %20 = arith.index_cast %19 : i32 to index
    %c0_17 = arith.constant 0 : index
    %21 = vector.load %arg3[%c0_16, %20, %c0_17] : memref<1x64x16xf32, #tpu.memory_space<vmem>>, vector<1x64x16xf32>
    %22 = vector.shape_cast %21 : vector<1x64x16xf32> to vector<64x16xf32>
    %c0_18 = arith.constant 0 : index
    %23 = memref.load %arg2[%c0_18] : memref<1xf32, #tpu.memory_space<smem>>
    %24 = vector.broadcast %23 : f32 to vector<64x16xf32>
    %25 = arith.mulf %24, %17 : vector<64x16xf32>
    %26 = arith.addf %22, %25 : vector<64x16xf32>
    %c0_19 = arith.constant 0 : index
    %c0_20 = arith.constant 0 : index
    %c0_21 = arith.constant 0 : index
    %27 = vector.load %arg7[%c0_19, %c0_20, %c0_21] : memref<1x64x16xf32, #tpu.memory_space<vmem>>, vector<1x64x16xf32>
    %28 = vector.shape_cast %27 : vector<1x64x16xf32> to vector<64x16xf32>
    %29 = vector.shape_cast %26 : vector<64x16xf32> to vector<1x64x16xf32>
    tpu.vector_store %arg7[%c0_19, %c0_20, %c0_21], %29 {strides = array<i32>} : memref<1x64x16xf32, #tpu.memory_space<vmem>>, vector<1x64x16xf32>,
    return
  }
  func.func @transform_0(%arg0: i32, %arg1: i32) -> i32 {
    %c0_i32 = arith.constant 0 : i32
    %c0_i32_0 = arith.constant 0 : i32
    return %c0_i32 : i32
  }
  func.func @transform_1(%arg0: i32, %arg1: i32) -> (i32, i32, i32) {
    %c0_i32 = arith.constant 0 : i32
    %c0_i32_0 = arith.constant 0 : i32
    %c0_i32_1 = arith.constant 0 : i32
    return %arg0, %c0_i32, %c0_i32_0 : i32, i32, i32
  }
  func.func @transform_2(%arg0: i32, %arg1: i32) -> (i32, i32, i32, i32) {
    %c0_i32 = arith.constant 0 : i32
    %c0_i32_0 = arith.constant 0 : i32
    %c0_i32_1 = arith.constant 0 : i32
    return %arg0, %c0_i32, %arg1, %c0_i32_0 : i32, i32, i32, i32
  }
  func.func @transform_3(%arg0: i32, %arg1: i32) -> (i32, i32) {
    %c0_i32 = arith.constant 0 : i32
    %c0_i32_0 = arith.constant 0 : i32
    %c0_i32_1 = arith.constant 0 : i32
    return %c0_i32, %c0_i32_0 : i32, i32
  }
  func.func @transform_4(%arg0: i32, %arg1: i32) -> (i32, i32) {
    %c0_i32 = arith.constant 0 : i32
    %c0_i32_0 = arith.constant 0 : i32
    %c0_i32_1 = arith.constant 0 : i32
    return %c0_i32, %c0_i32_0 : i32, i32
  }
  func.func @transform_5(%arg0: i32, %arg1: i32) -> (i32, i32, i32) {
    %c0_i32 = arith.constant 0 : i32
    %c0_i32_0 = arith.constant 0 : i32
    return %arg0, %arg1, %c0_i32 : i32, i32, i32
  }
}

</mosaic_0001>

<bundles_post_ra>
// kernel: tpu_custom_call.1
= control target key start
LH: loop header
LB: loop body
LE: loop exit
PB: predicated region body
PF: predicated region fallthrough
CT: control target
= control target key end

     0   :  { %s1547_s0 = inlined_call_operand.<no memory space> [shape: f32[1], index: 0, kind: input, shape index: {}]   ;;  %s1548_s1 = inlined_call_operand.vmem [shape: f32[2,64,16], index: 1, kind: input, shape index: {}]   ;;  %s1549_s2 = inlined_call_operand.hbm [shape: f32[2,2,64,64], index: 2, kind: input, shape index: {}]   ;;  %s1550_s3 = inlined_call_operand.vmem [shape: f32[16,32], index: 3, kind: input, shape index: {}]   ;;  %s1551_s4 = inlined_call_operand.vmem [shape: f32[32,16], index: 4, kind: input, shape index: {}]   ;;  %s1552_s5 = inlined_call_operand.vmem [shape: f32[2,64,16], index: 5, kind: output, shape index: {}]  }
   0x1   :  { %10 = sst [smem:[#allocation2]] %s1547_s0 }
   0x2   :  { %11 = vsyncpa [#allocation4], 0 }
   0x3   :  { %13 = vsyncpa [#allocation4 + $0x1], 0  ;;  %s1305_s20 = smov 0   ;;  %s1307_s21 = smov 0  }
   0x4   :  { %s1309_s22 = smov 0   ;;  %s1311_s23 = smov 0  }
   0x5   :  { %s1313_s24 = smov 0   ;;  %s1315_s25 = smov 0  }
   0x6 LB: > { %s954_s0 = sadd.s32 4294967295, %s1265_s25   ;;  %s31_s26 = sadd.s32 1, %s1261_s24  ;;  %s1265_s25 = sphi %s1315_s25, %s19_s25   ;;  %s1261_s24 = sphi %s1313_s24, %s1560_s24   ;;  %s1257_s23 = sphi %s1311_s23, %s1559_s23   ;;  %s1253_s22 = sphi %s1309_s22, %s1558_s22   ;;  %s1249_s21 = sphi %s1307_s21, %s1557_s21   ;;  %s1245_s20 = sphi %s1305_s20, %s1556_s20  }
   0x7   : > { %p33_p0 = scmp.ge.s32.totalorder %s31_s26, 2  ;;  %s87_s27 = sadd.s32 1, %s1253_s22 }
   0x8   : > { %p94_p1 = scmp.ne.s32.totalorder %s1253_s22, %s1249_s21  ;;  %p95_p2 = scmp.eq.s32.totalorder %s1265_s25, 0 }
   0x9   : > { %s1562_s26 = smov (%p33_p0, %s31_s26), 0  ;;  %p100_p4 = scmp.ne.s32.totalorder %s1249_s21, %s1245_s20 }
   0xa   : > { %p1341_p3 = por %p95_p2, %p94_p1  ;;  %s82_s29 = ssub.s32 %s1261_s24, %s1562_s26 }
   0xb   : > { %p101_p5 = scmp.eq.s32.totalorder %s954_s0, 0  ;;  %p85_p6 = scmp.eq.s32.totalorder %s82_s29, 0 }
   0xc   : > { %p1132_p8 = scmp.lt.s32.totalorder %s1265_s25, 2  ;;  %s211_s7 = sand.u32 1, %s1253_s22  }
   0xd   : > { %p1348_p7 = por %p101_p5, %p100_p4  ;;  %s1001_s8 = sshll.u32 %s1261_s24, 11 }
   0xe   : > { %s1354_s6 = scalar_select %p85_p6, %s1253_s22, %s87_s27  }
   0xf   : > { %s958_s9 = sshll.u32 %s211_s7, 7  ;;  %s1361_s12 = scalar_lea.hbm %s1549_s2, %s1001_s8 }
  0x10   : > { %s215_s13 = scalar_lea.vmem [#allocation3], %s958_s9  ;;  %p1365_p9 = pnand %p1132_p8, %p1341_p3 }
  0x11   : > { %s224_s14 = sshll.u32 %s215_s13, 4  ;;  %s1371_s16 = scalar_lea.sflag [#allocation4], %s211_s7  ;;  %s1369_s14 = int_to_ptr.vmem [resolvable:$true] %s224_s14 }
  0x12   : > { %s1185_s17 = scalar_lea.hbm %s1361_s12, 2048  ;;  %p1187_p11 = pneg %p1365_p9 }
  0x13   : > { %p1186_p10 = scmp.ne.s32.totalorder %s1361_s12, %s1185_s17  ;;  %s1190_s20 = scalar_lea.hbm %s1549_s2, 4096 }
  0x14   : > { %p1191_p0 = scmp.lt.u32.totalorder %s1361_s12, %s1549_s2  ;;  %p1192_p1 = scmp.lt.u32.totalorder %s1190_s20, %s1185_s17 }
  0x15   : > { %p1188_p12 = pnand %p1187_p11, %p1186_p10  ;;  %p1194_p3 = scmp.lt.u32.totalorder %s1185_s17, %s1361_s12 }
  0x16   : > { %p1193_p2 = por %p1192_p1, %p1191_p0 }
  0x17   : > { %p1189_p13 = pneg %p1188_p12 }
  0x18   : > { %p1195_p4 = por %p1194_p3, %p1193_p2 }
  0x1a   : > { %p1196_p5 = pnand %p1195_p4, %p1189_p13 }
  0x1c   : > { %1199 = shalt.err (!%p1196_p5)
}
  0x1d   : > { %s1200_s28 = scalar_lea.vmem %s1369_s14, 2048  ;;  %s1267_s29 = smov [#allocation3]  }
  0x1e   : > { %p1201_p6 = scmp.ne.s32.totalorder %s1369_s14, %s1200_s28  ;;  %s1205_s7 = sshll.u32 %s1267_s29, 4  ;;  %s1206_s7 = int_to_ptr.vmem [resolvable:$false] %s1205_s7 }
  0x1f   : > { %s1207_s8 = scalar_lea.vmem %s1206_s7, 4096  ;;  %p1208_p12 = scmp.lt.s32.totalorder %s1369_s14, %s1206_s7 }
  0x20   : > { %p1203_p8 = pnand %p1201_p6, %p1187_p11  ;;  %p1209_p0 = scmp.lt.s32.totalorder %s1207_s8, %s1200_s28 }
  0x22   : > { %p1204_p10 = pneg %p1203_p8  ;;  %p1210_p1 = por %p1209_p0, %p1208_p12 }
  0x24   : > { %p1211_p2 = pnand %p1210_p1, %p1204_p10 }
  0x26   : > { %1214 = shalt.err (!%p1211_p2)
}
  0x27   : > { %s1268_s9 = smov 128   ;;  %s1269_s10 = smov 8  }
  0x28   : > { %1131 = dma.hbm_to_vmem [thread:$0]  (!%p1365_p9), %s1361_s12, 2048, %s1369_s14, %s1371_s16, %s1268_s9, %s1268_s9, %s1269_s10  }
  0x29   : > { %p961_p11 = scmp.ge.s32.totalorder %s1265_s25, 1  ;;  %p232_p13 = scmp.lt.s32.totalorder %s1265_s25, 3 }
  0x2b   : > { %p233_p3 = pnand %p961_p11, %p232_p13 }
  0x2c   : > { %s238_s11 = sand.u32 (!%p233_p3), 1, %s1249_s21  }
  0x2d   : > { %236 = sbr.rel (%p233_p3) target bundleno = 969 (0x3c9), region = 40  ;;  %s962_s13 = sshll.u32 (!%p233_p3), %s238_s11, 7 }
  0x2e   : > { %s239_s17 = scalar_lea.sflag (!%p233_p3), [#allocation4], %s238_s11  ;;  %s1402_s18 = scalar_lea.vmem (!%p233_p3), [#allocation3], %s962_s13 }
  0x34   : > { %1240 = dma.done.wait (%p1348_p7), %s239_s17, 2048  }
  0x35   : > { %1242 = vsyncadd (%p1348_p7), %s239_s17, 4294965248  ;;  %p278_p4 = scmp.lt.s32.totalorder %s1257_s23, 1  ;;  %vm305_vm0 = vcmask 130048   ;;  %v303_v0 = vld [vmem:[%s1550_s3] sm:$0xff]  ;;  %v304_v1 = vld [vmem:[%s1550_s3 + $0x8] sm:$0xff]  ;;  %s1270_s27 = smov 112  }
  0x36   : > { %v1110_v3 = vpack.c.bf16 %v304_v1, %v303_v0  ;;  %v979_v14 = vld [vmem:[%s1402_s18 + $0x40] sm:$0xff]  ;;  %v980_v15 = vld [vmem:[%s1402_s18 + $0x48] sm:$0xff]  ;;  %vm451_vm1 = vcmask 523264   ;;  %v441_v28 = vld [vmem:[%s1402_s18 + $0x10] sm:$0xff]  ;;  %s1271_s17 = smov 16   ;;  %vm679_vm2 = vcmask 261120  }
  0x37   : > { %s1564_s23 = smov (!%p278_p4, %s1257_s23), 1  ;;  %v538_v17 = vpack.c.bf16 %v980_v15, %v979_v14  ;;  %v439_v26 = vld [vmem:[%s1402_s18] sm:$0xff]  ;;  %v440_v27 = vld [vmem:[%s1402_s18 + $0x8] sm:$0xff]  ;;  %v442_v30 = vld [vmem:[%s1402_s18 + $0x18] sm:$0xff] }
  0x38   : > { %s1002_s12 = sshll.u32 %s1564_s23, 6  ;;  %1111 = vmatprep.subr.bf16.mxu0 %v1110_v3  ;;  %v447_v29 = vpack.c.bf16 %v440_v27, %v439_v26  ;;  %v443_v31 = vld [vmem:[%s1402_s18 + $0x20] sm:$0xff]  ;;  %v444_v32 = vld [vmem:[%s1402_s18 + $0x28] sm:$0xff]  ;;  %v448_v33 = vpack.c.bf16 %v442_v30, %v441_v28  ;;  %v445_v35 = vld [vmem:[%s1402_s18 + $0x30] sm:$0xff] }
  0x39   : > { %s282_s16 = scalar_lea.vmem %s1548_s1, %s1002_s12  ;;  %1113 = vmatpush3.bf16.msra.mxu0 %v1110_v3  ;;  %v449_v34 = vpack.c.bf16 %v444_v32, %v443_v31  ;;  %v446_v36 = vld [vmem:[%s1402_s18 + $0x38] sm:$0xff]  ;;  %v981_v41 = vld [vmem:[%s1402_s18 + $0x50] sm:$0xff]  ;;  %v983_v43 = vld [vmem:[%s1402_s18 + $0x60] sm:$0xff] }
  0x3a   : > { %v1424_v2 = vld [vmem:[%s282_s16] sm:$0xff]  ;;  %v1428_v4 = vld [vmem:[%s282_s16 + $0x8] sm:$0xff]  ;;  %v1430_v5 = vld [vmem:[%s282_s16 + $0x10] sm:$0xff]  ;;  %1066 = vmatprep.mubr.msk.bf16.mxu1 %vm451_vm1, %v447_v29  ;;  %v450_v37 = vpack.c.bf16 %v446_v36, %v445_v35 }
  0x3b   : > { %1046 = vmatprep.mubr.msk.f32.mxu0 %vm305_vm0, %v1424_v2  ;;  %v1436_v6 = vld [vmem:[%s282_s16 + $0x18] sm:$0xff]  ;;  %v1438_v7 = vld [vmem:[%s282_s16 + $0x20] sm:$0xff]  ;;  %v1444_v8 = vld [vmem:[%s282_s16 + $0x28] sm:$0xff] }
  0x3c   : > { %1047 = vmatmul.mubr.msk.f32.vlgmr.msra.gmra.mrb[0].mxu0 %vm305_vm0, %v1428_v4  ;;  %v1446_v9 = vld [vmem:[%s282_s16 + $0x30] sm:$0xff]  ;;  %v1452_v10 = vld [vmem:[%s282_s16 + $0x38] sm:$0xff]  ;;  %v984_v44 = vld [vmem:[%s1402_s18 + $0x68] sm:$0xff]  ;;  %s292_s16 = scalar_lea.vmem %s1552_s5, %s1002_s12 }
  0x3d   : > { %1049 = vmatprep.mubr.msk.f32.mxu0 %vm305_vm0, %v1430_v5  ;;  %v982_v42 = vld [vmem:[%s1402_s18 + $0x58] sm:$0xff]  ;;  %v540_v47 = vpack.c.bf16 %v984_v44, %v983_v43  ;;  %v985_v48 = vld [vmem:[%s1402_s18 + $0x70] sm:$0xff]  ;;  %v675_v51 = vld [vmem:[%s1551_s4] sm:$0xff] }
  0x3e   : > { %v539_v46 = vpack.c.bf16 %v982_v42, %v981_v41  ;;  %v986_v49 = vld [vmem:[%s1402_s18 + $0x78] sm:$0xff]  ;;  %v676_v52 = vld [vmem:[%s1551_s4 + $0x8] sm:$0xff]  ;;  %v677_v54 = vld [vmem:[%s1551_s4 + $0x10] sm:$0xff]  ;;  %s819_s18 = sld [smem:[#allocation2]] }
  0x3f   : > { %v541_v50 = vpack.c.bf16 %v986_v49, %v985_v48  ;;  %v1114_v55 = vpack.c.bf16 %v676_v52, %v675_v51  ;;  %v678_v56 = vld [vmem:[%s1551_s4 + $0x18] sm:$0xff] }
  0x40   : > { %1050 = vmatmul.mubr.msk.f32.gmra.mrb[2].mxu0 %vm305_vm0, %v1436_v6  ;;  %v1118_v57 = vpack.c.bf16 %v678_v56, %v677_v54 }
  0x41   : > { %1052 = vmatprep.mubr.msk.f32.mxu0 %vm305_vm0, %v1438_v7 }
  0x44   : > { %1053 = vmatmul.mubr.msk.f32.gmra.mrb[4].mxu0 %vm305_vm0, %v1444_v8 }
  0x45   : > { %1055 = vmatprep.mubr.msk.f32.mxu0 %vm305_vm0, %v1446_v9 }
  0x48   : > { %1056 = vmatmul.mubr.msk.f32.gmra.mrb[6].mxu0 %vm305_vm0, %v1452_v10 }
  0x49   : > { %1082 = vmatprep.mubr.msk.bf16.mxu0 %vm451_vm1, %v538_v17 }
 0x10f   : > { %v1048_v11 = vpop.f32.mrb[0].mxu0 }
 0x110   : > { %v396_v12 = vpop.f32.mrb[1].mxu0 }
 0x111   : > { %v435_v13 = vpack.c.bf16 %v1048_v11, %v396_v12 }
 0x113   : > { %546 = vrot.lane.b32.xlu0 %v435_v13, %s1270_s27  ;;  %v1051_v16 = vpop.f32.mrb[2].mxu0  ;;  %1058 = vmatprep.subr.bf16.mxu1 %v435_v13 }
 0x114   : > { %v406_v18 = vpop.f32.mrb[3].mxu0  ;;  %1059 = vmatpush3.bf16.msra.mxu1 %v435_v13 }
 0x115   : > { %v436_v19 = vpack.c.bf16 %v1051_v16, %v406_v18 }
 0x117   : > { %548 = vrot.lane.b32.xlu0 %v436_v19, %s1270_s27  ;;  %v1054_v20 = vpop.f32.mrb[4].mxu0  ;;  %1060 = vmatprep.subr.bf16.mxu1 %v436_v19 }
 0x118   : > { %v416_v21 = vpop.f32.mrb[5].mxu0  ;;  %1061 = vmatpush3.bf16.msra.mxu1 %v436_v19 }
 0x119   : > { %v437_v22 = vpack.c.bf16 %v1054_v20, %v416_v21 }
 0x11b   : > { %550 = vrot.lane.b32.xlu1 %v437_v22, %s1270_s27  ;;  %v1057_v23 = vpop.f32.mrb[6].mxu0  ;;  %1062 = vmatprep.subr.bf16.mxu1 %v437_v22 }
 0x11c   : > { %v426_v24 = vpop.f32.mrb[7].mxu0  ;;  %1063 = vmatpush3.bf16.msra.mxu1 %v437_v22 }
 0x11d   : > { %v438_v25 = vpack.c.bf16 %v1057_v23, %v426_v24 }
 0x11f   : > { %552 = vrot.lane.b32.xlu1 %v438_v25, %s1270_s27  ;;  %1064 = vmatprep.subr.bf16.mxu1 %v438_v25 }
 0x120   : > { %1065 = vmatpush3.bf16.msra.mxu1 %v438_v25 }
 0x121   : > { %1122 = vmatprep.subr.bf16.mxu1 %v1114_v55 }
 0x123   : > { %1067 = vmatmul.mubr.msk.bf16.vlgmr.msra.gmra.mrb[0].mxu1 %vm451_vm1, %v448_v33  ;;  %v820_v33 = vstv %s819_s18 }
 0x124   : > { %1070 = vmatprep.mubr.msk.bf16.mxu1 %vm451_vm1, %v449_v34  ;;  %1124 = vmatpush3.bf16.msra.mxu1 %v1114_v55 }
 0x125   : > { %1123 = vmatprep.subr.bf16.mxu1 %v1118_v57 }
 0x128   : > { %1125 = vmatpush3.bf16.msra.mxu1 %v1118_v57 }
 0x12b   : > { %1071 = vmatmul.mubr.msk.bf16.gmra.mrb[4].mxu1 %vm451_vm1, %v450_v37 }
 0x185   : > { %v547_v38 = vpop.permute.xlu0 %546 }
 0x186   : > { %1074 = vmatprep.subr.bf16.mxu0 %v547_v38 }
 0x187   : > { %1075 = vmatpush3.bf16.msra.mxu0 %v547_v38 }
 0x189   : > { %v549_v39 = vpop.permute.xlu0 %548 }
 0x18a   : > { %1076 = vmatprep.subr.bf16.mxu0 %v549_v39 }
 0x18b   : > { %1077 = vmatpush3.bf16.msra.mxu0 %v549_v39 }
 0x18d   : > { %v551_v40 = vpop.permute.xlu1 %550 }
 0x18e   : > { %1078 = vmatprep.subr.bf16.mxu0 %v551_v40 }
 0x18f   : > { %1079 = vmatpush3.bf16.msra.mxu0 %v551_v40 }
 0x191   : > { %v553_v45 = vpop.permute.xlu1 %552 }
 0x192   : > { %1080 = vmatprep.subr.bf16.mxu0 %v553_v45 }
 0x193   : > { %1081 = vmatpush3.bf16.msra.mxu0 %v553_v45 }
 0x194   : > { %1115 = vmatprep.subr.bf16.mxu0 %v1114_v55 }
 0x196   : > { %1083 = vmatmul.mubr.msk.bf16.vlgmr.msra.gmra.mrb[8].mxu0 %vm451_vm1, %v539_v46 }
 0x197   : > { %1086 = vmatprep.mubr.msk.bf16.mxu0 %vm451_vm1, %v540_v47  ;;  %1117 = vmatpush3.bf16.msra.mxu0 %v1114_v55 }
 0x198   : > { %1119 = vmatprep.subr.bf16.mxu0 %v1118_v57 }
 0x19b   : > { %1121 = vmatpush3.bf16.msra.mxu0 %v1118_v57 }
 0x19e   : > { %1087 = vmatmul.mubr.msk.bf16.gmra.mrb[12].mxu0 %vm451_vm1, %v541_v50 }
 0x1f6   : > { %v1068_v53 = vpop.f32.mrb[0].mxu1 }
 0x1f7   : > { %v498_v58 = vpop.f32.mrb[1].mxu1 }
 0x1f8   : > { %v1069_v59 = vpop.f32.mrb[2].mxu1 }
 0x1f9   : > { %v501_v60 = vpop.f32.mrb[3].mxu1 }
 0x1fe   : > { %v1072_v61 = vpop.f32.mrb[4].mxu1 }
 0x1ff   : > { %v514_v62 = vpop.f32.mrb[5].mxu1 }
 0x200   : > { %v1073_v63 = vpop.f32.mrb[6].mxu1 }
 0x201   : > { %v517_v0 = vpop.f32.mrb[7].mxu1 }
 0x269   : > { %v1084_v1 = vpop.f32.mrb[8].mxu0 }
 0x26a   : > { %v604_v3 = vpop.f32.mrb[9].mxu0  ;;  %647 = vrot.lane.b32.xlu0 %v1084_v1, %s1271_s17 }
 0x26b   : > { %v1085_v11 = vpop.f32.mrb[10].mxu0 }
 0x26c   : > { %649 = vrot.lane.b32.xlu1 %v1085_v11, %s1271_s17  ;;  %v607_v12 = vpop.f32.mrb[11].mxu0 }
 0x271   : > { %v1088_v13 = vpop.f32.mrb[12].mxu0 }
 0x272   : > { %655 = vrot.lane.b32.xlu1 %v1088_v13, %s1271_s17  ;;  %v620_v14 = vpop.f32.mrb[13].mxu0 }
 0x273   : > { %651 = vrot.lane.b32.xlu0 %v620_v14, %s1271_s17  ;;  %v1089_v15 = vpop.f32.mrb[14].mxu0 }
 0x274   : > { %v623_v16 = vpop.f32.mrb[15].mxu0 }
 0x276   : > { %653 = vrot.lane.b32.xlu1 %v623_v16, %s1271_s17 }
 0x277   : > { %643 = vrot.lane.b32.xlu0 %v604_v3, %s1271_s17 }
 0x27a   : > { %657 = vrot.lane.b32.xlu1 %v1089_v15, %s1271_s17 }
 0x27b   : > { %645 = vrot.lane.b32.xlu0 %v607_v12, %s1271_s17 }
 0x2dc   : > { %v648_v17 = vpop.permute.xlu0 %647 }
 0x2dd   : > { %v669_v18 = vsel %vm305_vm0, %v1068_v53, %v648_v17 }
 0x2de   : > { %v650_v19 = vpop.permute.xlu1 %649  ;;  %1101 = vmatprep.mubr.msk.f32.mxu1 %vm679_vm2, %v669_v18 }
 0x2df   : > { %v670_v20 = vsel %vm305_vm0, %v1069_v59, %v650_v19 }
 0x2e0   : > { %1102 = vmatmul.mubr.msk.f32.vlgmr.msra.gmra.mrb[8].mxu1 %vm679_vm2, %v670_v20 }
 0x2e4   : > { %v656_v21 = vpop.permute.xlu1 %655 }
 0x2e5   : > { %v652_v22 = vpop.permute.xlu0 %651  ;;  %v673_v27 = vsel %vm305_vm0, %v1072_v61, %v656_v21 }
 0x2e6   : > { %v671_v23 = vsel %vm305_vm0, %v514_v62, %v652_v22 }
 0x2e7   : > { %1104 = vmatprep.mubr.msk.f32.mxu1 %vm679_vm2, %v671_v23 }
 0x2e8   : > { %v654_v24 = vpop.permute.xlu1 %653 }
 0x2e9   : > { %v672_v25 = vsel %vm305_vm0, %v517_v0, %v654_v24  ;;  %v644_v26 = vpop.permute.xlu0 %643 }
 0x2ea   : > { %v667_v28 = vsel %vm305_vm0, %v498_v58, %v644_v26  ;;  %1105 = vmatmul.mubr.msk.f32.gmra.mrb[10].mxu1 %vm679_vm2, %v672_v25 }
 0x2eb   : > { %1098 = vmatprep.mubr.msk.f32.mxu0 %vm679_vm2, %v667_v28  ;;  %1107 = vmatprep.mubr.msk.f32.mxu1 %vm679_vm2, %v673_v27 }
 0x2ec   : > { %v658_v29 = vpop.permute.xlu1 %657 }
 0x2ed   : > { %v674_v30 = vsel %vm305_vm0, %v1073_v63, %v658_v29  ;;  %v646_v31 = vpop.permute.xlu0 %645 }
 0x2ee   : > { %v668_v32 = vsel %vm305_vm0, %v501_v60, %v646_v31  ;;  %1108 = vmatmul.mubr.msk.f32.gmra.mrb[12].mxu1 %vm679_vm2, %v674_v30 }
 0x2ef   : > { %1099 = vmatmul.mubr.msk.f32.vlgmr.msra.gmra.mrb[16].mxu0 %vm679_vm2, %v668_v32 }
 0x3b3   : > { %v1103_v34 = vpop.f32.mrb[8].mxu1 }
 0x3b4   : > { %v824_v35 = vmul.f32 %v1103_v34, %v820_v33  ;;  %v780_v36 = vpop.f32.mrb[9].mxu1 }
 0x3b5   : > { %v823_v37 = vmul.f32 %v820_v33, %v780_v36 }
 0x3b6   : > { %v832_v38 = vadd.f32 %v824_v35, %v1436_v6 }
 0x3b7   : > { %v831_v39 = vadd.f32 %v823_v37, %v1430_v5 }
 0x3b8   : > { %840 = vst.msk [vmem:[%s292_s16 + $0x18] sm:$0xff] %vm305_vm0, %v832_v38 }
 0x3b9   : > { %839 = vst.msk [vmem:[%s292_s16 + $0x10] sm:$0xff] %vm305_vm0, %v831_v39 }
 0x3bd   : > { %v1106_v40 = vpop.f32.mrb[10].mxu1 }
 0x3be   : > { %v826_v41 = vmul.f32 %v1106_v40, %v820_v33  ;;  %v790_v42 = vpop.f32.mrb[11].mxu1 }
 0x3bf   : > { %v825_v43 = vmul.f32 %v820_v33, %v790_v42 }
 0x3c0   : > { %v834_v44 = vadd.f32 %v826_v41, %v1444_v8 }
 0x3c1   : > { %v833_v45 = vadd.f32 %v825_v43, %v1438_v7  ;;  %v1109_v46 = vpop.f32.mrb[12].mxu1 }
 0x3c2   : > { %842 = vst.msk [vmem:[%s292_s16 + $0x28] sm:$0xff] %vm305_vm0, %v834_v44  ;;  %v828_v47 = vmul.f32 %v1109_v46, %v820_v33  ;;  %v1100_v48 = vpop.f32.mrb[16].mxu0  ;;  %v800_v6 = vpop.f32.mrb[13].mxu1 }
 0x3c3   : > { %841 = vst.msk [vmem:[%s292_s16 + $0x20] sm:$0xff] %vm305_vm0, %v833_v45  ;;  %v822_v5 = vmul.f32 %v1100_v48, %v820_v33  ;;  %v827_v49 = vmul.f32 %v820_v33, %v800_v6  ;;  %v770_v50 = vpop.f32.mrb[17].mxu0 }
 0x3c4   : > { %v836_v51 = vadd.f32 %v828_v47, %v1452_v10  ;;  %v821_v52 = vmul.f32 %v820_v33, %v770_v50 }
 0x3c5   : > { %v830_v53 = vadd.f32 %v822_v5, %v1428_v4  ;;  %v835_v8 = vadd.f32 %v827_v49, %v1446_v9 }
 0x3c6   : > { %844 = vst.msk [vmem:[%s292_s16 + $0x38] sm:$0xff] %vm305_vm0, %v836_v51  ;;  %v829_v7 = vadd.f32 %v821_v52, %v1424_v2 }
 0x3c7   : > { %838 = vst.msk [vmem:[%s292_s16 + $0x8] sm:$0xff] %vm305_vm0, %v830_v53  ;;  %843 = vst.msk [vmem:[%s292_s16 + $0x30] sm:$0xff] %vm305_vm0, %v835_v8 }
 0x3c8   : > { %837 = vst.msk [vmem:[%s292_s16] sm:$0xff] %vm305_vm0, %v829_v7 }
 0x3c9 PF: > { %s19_s25 = sadd.s32 1, %s1265_s25   ;;  %s1556_s20 = smov %s1249_s21 }
 0x3ca   : > { %p16_p7 = scmp.ge.s32.totalorder %s19_s25, 4   ;;  %s1557_s21 = smov %s1253_s22 }
 0x3cb   : > { %s1558_s22 = smov %s1354_s6  ;;  %s1559_s23 = smov %s1261_s24 }
 0x3cc   : > { %s1560_s24 = smov %s1562_s26  ;;  %18 = sbr.rel (!%p16_p7) target bundleno = 6 (0x6), region = 85 }
 0x3d3   :  { %875 = vsyncpa [#allocation4], 1 }
 0x3d4   :  { %877 = vsyncpa [#allocation4 + $0x1], 1 }

</bundles_post_ra>
